<compile_context>
chip_gen: v7x
topology: tpu7x:2x2x1
jax: 0.10.0
libtpu: 0.0.40
codegen_flags: <defaults>
</compile_context>

<pallas_src>
import math
import functools

import jax
import jax.numpy as jnp
from jax.experimental import pallas as pl
from jax.experimental.pallas import tpu as pltpu


def _round_up(x, m):
    return ((x + m - 1) // m) * m


def _vmem_limit_bytes():
    """Generation-aware scoped-VMEM ceiling (leave headroom for double buffers)."""
    cap = 64 * 1024 * 1024  # conservative fallback = v7x physical VMEM per TC
    try:
        cap = int(pltpu.get_tpu_info().vmem_capacity_bytes)
    except Exception:
        pass
    # ~96 MiB on v5e/v6e (128 MiB physical), ~48 MiB on v7x (64 MiB physical)
    return min(96 * 1024 * 1024, int(0.75 * cap))


def _pick_tile(total, candidates):
    for cand in candidates:
        if total % cand == 0:
            return cand
    return total


def _pick_n_tile(n_total, c, w, vmem_limit, batch):
    """Largest lane-aligned TN dividing N within a conservative VMEM budget."""
    budget = vmem_limit // 8

    def cost(tn):
        out_blk = 2 * c * tn * 4              # double-buffered f32 out block
        off_blk = 2 * 2 * tn * 4              # double-buffered f32 offsets
        acc = c * tn * 4                      # f32 accumulator scratch
        rx = _round_up(w, 16) * tn * 2        # bf16 rx scratch
        return out_blk + off_blk + acc + rx

    tn = None
    for cand in (2048, 1024, 512, 256, 128):
        if n_total % cand == 0 and cost(cand) <= budget:
            tn = cand
            break
    if tn is None:
        tn = n_total  # fallback for awkward N (may be non-128-aligned)
    # keep >= 2 independent leading grid points so v7x megacore uses both TCs
    while (batch * (n_total // tn) < 2 and tn > 128 and tn % 2 == 0
           and n_total % (tn // 2) == 0):
        tn //= 2
    return tn


def _pick_h_tile(h, c, w, tn, vmem_limit):
    """H-tile: full H if it fits the budget, else largest multiple-of-16 divisor."""
    budget = vmem_limit // 4
    w_pad = _round_up(w, 128)

    def cost(th):
        x_blk = 2 * c * th * w_pad * 2        # double-buffered bf16 x block (lane pad)
        t_tmp = c * th * tn * 4               # f32 matmul result / weighted temp
        return x_blk + 2 * t_tmp

    if cost(h) <= budget:
        return h                              # single reduction step
    best = None
    for th in range(16, h, 16):               # multiples of 16 keep bf16 tiling clean
        if h % th == 0 and cost(th) <= budget:
            best = th
    if best is None:
        for th in range(16, h, 16):
            if h % th == 0:
                best = th
    return best if best is not None else h


# ----------------------------- Pallas kernels ------------------------------

def _conv1x1_kernel(w_ref, b_ref, x_ref, o_ref):
    # w_ref: (Cout, Cin), b_ref: (Cout, 1), x_ref: (1, Cin, TM), o_ref: (1, Cout, TM)
    o_ref[0] = (jnp.dot(w_ref[...], x_ref[0],
                        preferred_element_type=jnp.float32) + b_ref[...])


def conv1x1(x_flat, wmat, bias, *, m_tile=None):
    """x_flat: (b, Cin, M), wmat: (Cout, Cin), bias: (Cout,) -> (b, Cout, M)."""
    b, cin, m = x_flat.shape
    cout = wmat.shape[0]
    vmem_limit = _vmem_limit_bytes()
    # mem-bound (tiny Cout): large TM amortizes per-step overhead toward roofline.
    tm = m_tile if m_tile is not None else _pick_tile(m, (2048, 1024, 512, 256, 128))
    flops = 2 * b * cout * cin * m
    bytes_accessed = 4 * (b * cin * m + cout * cin + cout + b * cout * m)
    return pl.pallas_call(
        _conv1x1_kernel,
        out_shape=jax.ShapeDtypeStruct((b, cout, m), jnp.float32),
        grid=(b, m // tm),
        in_specs=[pl.BlockSpec((cout, cin), lambda bi, mi: (0, 0)),
                  pl.BlockSpec((cout, 1), lambda bi, mi: (0, 0)),
                  pl.BlockSpec((1, cin, tm), lambda bi, mi: (bi, 0, mi))],
        out_specs=pl.BlockSpec((1, cout, tm), lambda bi, mi: (bi, 0, mi)),
        compiler_params=pltpu.CompilerParams(
            dimension_semantics=("parallel", "parallel"),
            vmem_limit_bytes=vmem_limit),
        cost_estimate=pl.CostEstimate(flops=flops, transcendentals=0,
                                      bytes_accessed=bytes_accessed),
    )(wmat, bias.reshape(cout, 1), x_flat)


def _grid_sample_kernel(x_ref, off_ref, o_ref, acc_ref, rx_ref, *, H, W):
    # x_ref:   (1, C, TH, W)  bf16 rows [hi*TH, (hi+1)*TH) of the image
    # off_ref: (1, 2, TN)     f32 absolute (x, y) sample coordinates
    # o_ref:   (1, C, TN)     f32 output block (resident across the H axis)
    # acc_ref: (C, TN)        f32 accumulator scratch
    # rx_ref:  (W, TN)        bf16 x-direction bilinear factor (hoisted over H)
    hi = pl.program_id(2)
    c = x_ref.shape[1]
    th = x_ref.shape[2]
    tn = off_ref.shape[2]

    off = off_ref[0]                      # (2, TN)
    px = off[0:1, :]                      # (1, TN) width coordinate
    py = off[1:2, :]                      # (1, TN) height coordinate

    @pl.when(hi == 0)
    def _init():
        acc_ref[...] = jnp.zeros_like(acc_ref)
        # rx depends only on (b, n): compute once per (b, n) tile, reuse for
        # every H reduction step.  Border-clamped corner indices kept in f32
        # (floor values are exact small integers) so the one-hot compares
        # avoid any f32->i32 round trip.
        # TODO(synk): exact out-of-range behaviour of the closed-source CUDA
        # grid_sample_deterministic_forward is unavailable; border clamping of
        # the corner indices (bilinear weights untouched) is assumed.
        x0f = jnp.floor(px)
        wx1 = px - x0f
        wx0 = 1.0 - wx1
        x0 = jnp.clip(x0f, 0.0, float(W - 1))
        x1 = jnp.clip(x0f + 1.0, 0.0, float(W - 1))
        col = jax.lax.broadcasted_iota(jnp.float32, (W, tn), 0)
        rx = jnp.where(col == x0, wx0, 0.0) + jnp.where(col == x1, wx1, 0.0)
        rx_ref[...] = rx.astype(jnp.bfloat16)

    # y-direction factor for this H tile (TH, TN); stays f32 for the VPU.
    y0f = jnp.floor(py)
    wy1 = py - y0f
    wy0 = 1.0 - wy1
    y0 = jnp.clip(y0f, 0.0, float(H - 1))
    y1 = jnp.clip(y0f + 1.0, 0.0, float(H - 1))
    h0 = (hi * th).astype(jnp.float32)
    row = jax.lax.broadcasted_iota(jnp.float32, (th, tn), 0) + h0
    ry = jnp.where(row == y0, wy0, 0.0) + jnp.where(row == y1, wy1, 0.0)  # (TH, TN)

    # Factored bilinear sample:
    #   MXU contracts the W axis: (C*TH, W) @ (W, TN) -> (C*TH, TN) f32
    #   VPU weights by ry and reduces the H-tile rows: only C*TH*TN ops.
    xt = x_ref[0].reshape(c * th, W)                                   # free merge
    t = jnp.dot(xt, rx_ref[...], preferred_element_type=jnp.float32)   # (C*TH, TN)
    acc_ref[...] += jnp.sum(t.reshape(c, th, tn) * ry[None, :, :], axis=1)

    @pl.when(hi == pl.num_programs(2) - 1)
    def _store():
        o_ref[0] = acc_ref[...].astype(o_ref.dtype)


def grid_sample_deterministic(x, offset, *, n_tile=None, h_tile=None):
    """x: (b, c, h, w), offset: (b, 2, N) absolute pixel coords -> (b, c, N)."""
    b, c, h, w = x.shape
    _, two, n_total = offset.shape
    assert two == 2
    vmem_limit = _vmem_limit_bytes()

    # bf16 x in HBM: halves DMA bytes; MXU sees bf16 either way.
    x_bf16 = x.astype(jnp.bfloat16)
    offset = offset.astype(jnp.float32)

    tn = n_tile if n_tile is not None else _pick_n_tile(n_total, c, w, vmem_limit, b)
    th = h_tile if h_tile is not None else _pick_h_tile(h, c, w, tn, vmem_limit)

    kern = functools.partial(_grid_sample_kernel, H=h, W=w)
    flops = 2 * b * c * h * w * n_total + 8 * b * h * n_total
    bytes_accessed = (2 * b * c * h * w * (n_total // tn)   # bf16 x, re-read per N tile
                      + 4 * b * 2 * n_total * (h // th)     # offsets, re-read per H step
                      + 4 * b * c * n_total)                # f32 output
    return pl.pallas_call(
        kern,
        out_shape=jax.ShapeDtypeStruct((b, c, n_total), jnp.float32),
        grid=(b, n_total // tn, h // th),
        in_specs=[pl.BlockSpec((1, c, th, w), lambda bi, ni, hi: (bi, 0, hi, 0)),
                  pl.BlockSpec((1, 2, tn), lambda bi, ni, hi: (bi, 0, ni))],
        out_specs=pl.BlockSpec((1, c, tn), lambda bi, ni, hi: (bi, 0, ni)),
        scratch_shapes=[pltpu.VMEM((c, tn), jnp.float32),
                        pltpu.VMEM((w, tn), jnp.bfloat16)],
        compiler_params=pltpu.CompilerParams(
            dimension_semantics=("parallel", "parallel", "arbitrary"),
            vmem_limit_bytes=vmem_limit),
        cost_estimate=pl.CostEstimate(flops=flops, transcendentals=0,
                                      bytes_accessed=bytes_accessed),
    )(x_bf16, offset)


# ------------------------------ glue (plain JAX) ---------------------------

def _make_offsets(conv_out, s, offset_factor):
    """conv_out: (b, 2*s*s, H, W) -> absolute-coordinate offset (b, 2, N)."""
    b, _, H, W = conv_out.shape
    o1, o2 = conv_out[:, : s * s], conv_out[:, s * s:]
    coods = jnp.arange(0, 1, 1.0 / s, dtype=jnp.float32)
    x_bb, y_bb = jnp.meshgrid(coods, coods, indexing='xy')     # (s, s) each
    x_bb = x_bb.reshape(1, s * s, 1, 1)
    y_bb = y_bb.reshape(1, s * s, 1, 1)
    x_cood = jnp.arange(W, dtype=jnp.float32).reshape(1, 1, 1, W)
    y_cood = jnp.arange(H, dtype=jnp.float32).reshape(1, 1, H, 1)
    o1 = offset_factor * o1 + x_cood + x_bb
    o2 = offset_factor * o2 + y_cood + y_bb
    offset = jnp.stack((o1, o2), axis=1)                       # (b,2,s*s,H,W)
    offset = (offset.reshape(b, 2, s, s, H, W)
              .transpose(0, 1, 4, 2, 5, 3)
              .reshape(b, 2, -1))                              # (b, 2, N)
    return offset


def deform_upsample_forward(x, conv_w, conv_b, scale_factor=2):
    """DeformUpSample.forward with mask=False, kernel_size=1 (module default)."""
    b, c, h, w = x.shape
    s = scale_factor
    offset_factor = math.sqrt(128.0 / c)
    cout = 2 * s * s
    x_flat = x.reshape(b, c, h * w).astype(jnp.float32)
    wmat = conv_w.reshape(cout, c).astype(jnp.float32)            # (Cout, Cin)
    conv_out = conv1x1(x_flat, wmat, conv_b.astype(jnp.float32))  # (b, Cout, H*W)
    conv_out = conv_out.reshape(b, cout, h, w)
    # TODO(synk): the offset post-processing (scale + coordinate grid + the
    # (b,2,s,s,H,W) permute) stays in plain XLA; fusing the sub-pixel
    # interleave into the sampling kernel is not worth it at 8*N*b bytes.
    offset = _make_offsets(conv_out, s, offset_factor)            # (b, 2, N)
    y = grid_sample_deterministic(x, offset)                      # (b, c, N)
    return y.reshape(b, c, s * h, s * w)


# ----------------------------- pure-JAX references -------------------------

def _ref_sample(x, offset):
    """Gather-based bilinear sample with border clamp: (b,c,h,w),(b,2,N)->(b,c,N)."""
    b, c, h, w = x.shape
    px, py = offset[:, 0], offset[:, 1]
    x0f, y0f = jnp.floor(px), jnp.floor(py)
    wx1, wy1 = px - x0f, py - y0f
    wx0, wy0 = 1.0 - wx1, 1.0 - wy1
    x0 = jnp.clip(x0f.astype(jnp.int32), 0, w - 1)
    x1 = jnp.clip(x0f.astype(jnp.int32) + 1, 0, w - 1)
    y0 = jnp.clip(y0f.astype(jnp.int32), 0, h - 1)
    y1 = jnp.clip(y0f.astype(jnp.int32) + 1, 0, h - 1)
    xf = x.reshape(b, c, h * w)

    def g(idx):
        idx = jnp.broadcast_to(idx[:, None, :], (b, c, idx.shape[-1]))
        return jnp.take_along_axis(xf, idx, axis=2)

    return (g(y0 * w + x0) * (wy0 * wx0)[:, None, :]
            + g(y0 * w + x1) * (wy0 * wx1)[:, None, :]
            + g(y1 * w + x0) * (wy1 * wx0)[:, None, :]
            + g(y1 * w + x1) * (wy1 * wx1)[:, None, :])


# ----------------------------------- main -----------------------------------

if __name__ == "__main__":
    b, c, h, w, s = 2, 4, 16, 16, 2
    key = jax.random.PRNGKey(0)
    k1, k2, k3 = jax.random.split(key, 3)
    x = jax.random.normal(k1, (b, c, h, w), dtype=jnp.float32)
    # The module's init_weights() zeroes conv_offset; small deterministic random
    # values are used instead so the offset / sampling path is actually exercised.
    conv_w = 0.1 * jax.random.normal(k2, (2 * s * s, c, 1, 1), dtype=jnp.float32)
    conv_b = 0.1 * jax.random.normal(k3, (2 * s * s,), dtype=jnp.float32)

    # End-to-end forward through both Pallas kernels.
    y = deform_upsample_forward(x, conv_w, conv_b, scale_factor=s)
    y = jax.block_until_ready(y)
    assert y.shape == (b, c, s * h, s * w), y.shape

    # Stage 1: 1x1 conv kernel vs full-precision einsum.
    cout = 2 * s * s
    conv_pal = conv1x1(x.reshape(b, c, h * w), conv_w.reshape(cout, c),
                       conv_b).reshape(b, cout, h, w)
    conv_ref = (jnp.einsum('bchw,oc->bohw', x, conv_w.reshape(cout, c),
                           precision=jax.lax.Precision.HIGHEST)
                + conv_b.reshape(1, cout, 1, 1))
    conv_err = float(jnp.max(jnp.abs(conv_pal - conv_ref)))
    assert jnp.allclose(conv_pal, conv_ref, rtol=2e-2, atol=2e-2), conv_err

    # Stage 2: deterministic grid-sample kernel vs gather-based bilinear, using
    # the SAME offsets (sampling matmul uses bf16 MXU operands with f32
    # accumulation -> tolerance relaxed vs the f32 reference).
    offset = _make_offsets(conv_pal, s, math.sqrt(128.0 / c))
    samp_pal = grid_sample_deterministic(x, offset)
    samp_ref = _ref_sample(x, offset)
    samp_err = float(jnp.max(jnp.abs(samp_pal - samp_ref)))
    assert jnp.allclose(samp_pal, samp_ref, rtol=5e-2, atol=5e-2), samp_err

    # Glue consistency: the forward output is exactly the sampled values reshaped.
    assert jnp.allclose(y, samp_pal.reshape(b, c, s * h, s * w), rtol=5e-2, atol=5e-2)

    print("KERNEL_OK")
</pallas_src>

<mosaic_0001>
module attributes {stable_mosaic.version = 11 : i64} {
  func.func @_conv1x1_kernel(%arg0: i32, %arg1: i32, %arg2: memref<8x4xf32, #tpu.memory_space<vmem>>, %arg3: memref<8x1xf32, #tpu.memory_space<vmem>>, %arg4: memref<1x4x256xf32, #tpu.memory_space<vmem>>, %arg5: memref<1x8x256xf32, #tpu.memory_space<vmem>>) attributes {dimension_semantics = [#tpu.dimension_semantics<parallel>, #tpu.dimension_semantics<parallel>], iteration_bounds = array<i64: 2, 1>, scalar_prefetch = 0 : i64, scratch_operands = 0 : i64, tpu.core_type = #tpu.core_type<tc>, window_params = [{pipeline_mode = #tpu.pipeline_mode<synchronous>, transform_indices = @transform_0, window_bounds = array<i64: 8, 4>}, {pipeline_mode = #tpu.pipeline_mode<synchronous>, transform_indices = @transform_1, window_bounds = array<i64: 8, 1>}, {transform_indices = @transform_2, window_bounds = array<i64: 1, 4, 256>}, {transform_indices = @transform_3, window_bounds = array<i64: 1, 8, 256>}]} {
    %c0 = arith.constant 0 : index
    %c0_0 = arith.constant 0 : index
    %0 = vector.load %arg2[%c0, %c0_0] : memref<8x4xf32, #tpu.memory_space<vmem>>, vector<8x4xf32>
    %c0_1 = arith.constant 0 : index
    %c0_2 = arith.constant 0 : index
    %c0_3 = arith.constant 0 : index
    %1 = vector.load %arg4[%c0_1, %c0_2, %c0_3] : memref<1x4x256xf32, #tpu.memory_space<vmem>>, vector<1x4x256xf32>
    %2 = vector.shape_cast %1 : vector<1x4x256xf32> to vector<4x256xf32>
    %cst = arith.constant dense<0.000000e+00> : vector<8x256xf32>
    %3 = tpu.matmul %0, %2, %cst {dimension_numbers = #tpu.dot_dimension_numbers<[1], [0], [0], [1], [0, 0, 1, 1], [], []>} : vector<8x4xf32>, vector<4x256xf32>, vector<8x256xf32> -> vector<8x256xf32>
    %c0_4 = arith.constant 0 : index
    %c0_5 = arith.constant 0 : index
    %4 = vector.load %arg3[%c0_4, %c0_5] : memref<8x1xf32, #tpu.memory_space<vmem>>, vector<8x1xf32>
    %5 = vector.broadcast %4 : vector<8x1xf32> to vector<8x256xf32>
    %6 = arith.addf %3, %5 : vector<8x256xf32>
    %c0_6 = arith.constant 0 : index
    %c0_7 = arith.constant 0 : index
    %c0_8 = arith.constant 0 : index
    %7 = vector.load %arg5[%c0_6, %c0_7, %c0_8] : memref<1x8x256xf32, #tpu.memory_space<vmem>>, vector<1x8x256xf32>
    %8 = vector.shape_cast %7 : vector<1x8x256xf32> to vector<8x256xf32>
    %9 = vector.shape_cast %6 : vector<8x256xf32> to vector<1x8x256xf32>
    tpu.vector_store %arg5[%c0_6, %c0_7, %c0_8], %9 {strides = array<i32>} : memref<1x8x256xf32, #tpu.memory_space<vmem>>, vector<1x8x256xf32>,
    return
  }
  func.func @transform_0(%arg0: i32, %arg1: i32) -> (i32, i32) {
    %c0_i32 = arith.constant 0 : i32
    %c0_i32_0 = arith.constant 0 : i32
    %c0_i32_1 = arith.constant 0 : i32
    return %c0_i32, %c0_i32_0 : i32, i32
  }
  func.func @transform_1(%arg0: i32, %arg1: i32) -> (i32, i32) {
    %c0_i32 = arith.constant 0 : i32
    %c0_i32_0 = arith.constant 0 : i32
    %c0_i32_1 = arith.constant 0 : i32
    return %c0_i32, %c0_i32_0 : i32, i32
  }
  func.func @transform_2(%arg0: i32, %arg1: i32) -> (i32, i32, i32) {
    %c0_i32 = arith.constant 0 : i32
    %c0_i32_0 = arith.constant 0 : i32
    return %arg0, %c0_i32, %arg1 : i32, i32, i32
  }
  func.func @transform_3(%arg0: i32, %arg1: i32) -> (i32, i32, i32) {
    %c0_i32 = arith.constant 0 : i32
    %c0_i32_0 = arith.constant 0 : i32
    return %arg0, %c0_i32, %arg1 : i32, i32, i32
  }
}

</mosaic_0001>

<bundles_post_ra>
// kernel: tpu_custom_call.1
= control target key start
LH: loop header
LB: loop body
LE: loop exit
PB: predicated region body
PF: predicated region fallthrough
CT: control target
= control target key end

     0   :  { %8 = vsyncpa [#allocation3], 0  ;;  %s683_s0 = inlined_call_operand.vmem [shape: f32[8,4], index: 0, kind: input, shape index: {}]   ;;  %s684_s1 = inlined_call_operand.vmem [shape: f32[8,1], index: 1, kind: input, shape index: {}]   ;;  %s685_s2 = inlined_call_operand.vmem [shape: f32[2,4,256], index: 2, kind: input, shape index: {}]   ;;  %s686_s3 = inlined_call_operand.hbm [shape: f32[2,8,256], index: 3, kind: output, shape index: {}]  }
   0x1   :  { %10 = vsyncpa [#allocation3 + $0x1], 0  ;;  %s565_s12 = smov 0   ;;  %s567_s13 = smov 0  }
   0x2   :  { %s569_s14 = smov 0   ;;  %s571_s15 = smov 0  }
   0x3   :  { %s573_s16 = smov 0   ;;  %s575_s17 = smov 0  }
   0x4 LB: > { %s385_s18 = sadd.s32 4294967295, %s540_s17   ;;  %s386_s19 = sadd.s32 4294967294, %s540_s17   ;;  %s540_s17 = sphi %s575_s17, %s16_s17   ;;  %s536_s16 = sphi %s573_s16, %s693_s16   ;;  %s532_s15 = sphi %s571_s15, %s692_s15   ;;  %s528_s14 = sphi %s569_s14, %s691_s14   ;;  %s524_s13 = sphi %s567_s13, %s690_s13   ;;  %s520_s12 = sphi %s565_s12, %s689_s12  }
   0x5   : > { %s28_s20 = sadd.s32 1, %s536_s16  ;;  %s107_s21 = sadd.s32 1, %s528_s14 }
   0x6   : > { %p30_p0 = scmp.ge.s32.totalorder %s28_s20, 2  ;;  %p117_p1 = scmp.ne.s32.totalorder %s528_s14, %s524_s13 }
   0x7   : > { %p118_p2 = scmp.eq.s32.totalorder %s385_s18, 1  ;;  %p123_p3 = scmp.ne.s32.totalorder %s524_s13, %s520_s12 }
   0x8   : > { %s695_s20 = smov (%p30_p0, %s28_s20), 0  ;;  %p124_p5 = scmp.eq.s32.totalorder %s386_s19, 1 }
   0x9   : > { %p605_p4 = por %p118_p2, %p117_p1  ;;  %s102_s23 = ssub.s32 %s536_s16, %s695_s20 }
   0xa   : > { %p389_p6 = scmp.ge.s32.totalorder %s540_s17, 1  ;;  %p105_p7 = scmp.eq.s32.totalorder %s102_s23, 0 }
   0xb   : > { %p612_p8 = por %p124_p5, %p123_p3  ;;  %p161_p9 = scmp.lt.s32.totalorder %s540_s17, 3 }
   0xc   : > { %s618_s25 = scalar_select %p105_p7, %s528_s14, %s107_s21  }
   0xd   : > { %p162_p10 = pnand %p389_p6, %p161_p9 }
   0xe   : > { %p190_p11 = scmp.lt.s32.totalorder (!%p162_p10), %s532_s15, 1  ;;  %v542_v0 = vmov (!%p162_p10), 0.0   ;;  %v543_v1 = vmov (!%p162_p10), 0   ;;  %v202_v2 = vld [vmem:[%s684_s1] sm:$0xff] (!%p162_p10)  ;;  %vm214_vm0 = vcmask (!%p162_p10), 1043456   ;;  %vm210_vm1 = vcmask (!%p162_p10), 31744  }
   0xf   : > { %165 = sbr.rel (%p162_p10) target bundleno = 260 (0x104), region = 32  ;;  %283 = vmatprep.mubr.f32.mxu0 (!%p162_p10), %v542_v0  ;;  %460 = vset.pattern.permute.xlu0 (!%p162_p10), %v543_v1  ;;  %v200_v5 = vld [vmem:[%s683_s0] sm:$0xff] (!%p162_p10)  ;;  %s186_s8 = sand.u32 (!%p162_p10), 1, %s524_s13  }
  0x10   : > { %205 = vperm.xlu0 (!%p162_p10), %460, %v202_v2   ;;  %s390_s9 = sshll.u32 (!%p162_p10), %s186_s8, 4  ;;  %s402_s10 = sshll.u32 (!%p162_p10), %s532_s15, 8 }
  0x11   : > { %s188_s11 = scalar_lea.vmem (!%p162_p10), [#allocation2], %s390_s9  ;;  %s636_s23 = scalar_lea.hbm (!%p162_p10), %s686_s3, %s402_s10 }
  0x12   : > { %s309_s18 = sshll.u32 (!%p162_p10), %s188_s11, 4  ;;  %s293_s26 = scalar_lea.sflag (!%p162_p10), [#allocation3], %s186_s8  ;;  %s638_s18 = int_to_ptr.vmem [resolvable:$true] %s309_s18 }
  0x13   : > { %s544_s27 = smov (!%p162_p10), [#allocation2]  }
  0x16   : > { %s191_s28 = scalar_select %p190_p11, %s532_s15, 1 }
  0x17   : > { %s462_s15 = scalar_lea.vmem %s638_s18, 256 }
  0x18   : > { %s401_s29 = sshll.u32 %s191_s28, 3  ;;  %p463_p12 = scmp.ne.s32.totalorder %s638_s18, %s462_s15 }
  0x19   : > { %s197_s5 = scalar_lea.vmem %s685_s2, %s401_s29  ;;  %s466_s28 = sshll.u32 %s544_s27, 4  ;;  %s467_s28 = int_to_ptr.vmem [resolvable:$false] %s466_s28 }
  0x1a   : > { %v201_v3 = vld [vmem:[%s197_s5] sm:$0xff]  ;;  %p464_p13 = pnand %p463_p12, %p605_p4  ;;  %s468_s29 = scalar_lea.vmem %s467_s28, 512 }
  0x1b   : > { %v209_v4 = vcombine.high %v201_v3, %v201_v3  ;;  %p469_p1 = scmp.lt.s32.totalorder %s638_s18, %s467_s28  ;;  %p470_p2 = scmp.lt.s32.totalorder %s468_s29, %s462_s15 }
  0x1c   : > { %p465_p0 = pneg %p464_p13 }
  0x1d   : > { %393 = vmatprep.subr.msk.mxu0 %vm214_vm0, %v209_v4  ;;  %p471_p3 = por %p470_p2, %p469_p1 }
  0x1e   : > { %394 = vmatpush1.msk.msra.mxu0 %vm214_vm0, %v201_v3 }
  0x1f   : > { %395 = vmatmul.mubr.msk.f32.vlgmr.msra.gmra.mrb[0].mxu0 %vm210_vm1, %v200_v5  ;;  %p472_p5 = pnand %p471_p3, %p465_p0 }
  0x8f   : > { %v206_v6 = vpop.permute.xlu0 %205 }
  0xf2   : > { %v285_v7 = vpop.f32.mrb[0].mxu0 }
  0xf3   : > { %v286_v8 = vadd.f32 %v285_v7, %v206_v6  ;;  %v287_v9 = vpop.f32.mrb[1].mxu0 }
  0xf4   : > { %v288_v10 = vadd.f32 %v287_v9, %v206_v6 }
  0xf5   : > { %290 = vst [vmem:[%s188_s11] sm:$0xff] %v286_v8 }
  0xf6   : > { %291 = vst [vmem:[%s188_s11 + $0x8] sm:$0xff] %v288_v10 }
  0xf7   : > { %475 = shalt.err (!%p472_p5)
}
  0xf8   : > { %s476_s30 = scalar_lea.hbm %s636_s23, 256  ;;  %s480_s6 = scalar_lea.hbm %s686_s3, 512 }
  0xf9   : > { %p477_p6 = scmp.ne.s32.totalorder %s636_s23, %s476_s30  ;;  %p481_p10 = scmp.lt.u32.totalorder %s636_s23, %s686_s3 }
  0xfa   : > { %p482_p11 = scmp.lt.u32.totalorder %s480_s6, %s476_s30  ;;  %p484_p13 = scmp.lt.u32.totalorder %s476_s30, %s636_s23 }
  0xfb   : > { %p478_p7 = pnand %p477_p6, %p605_p4 }
  0xfc   : > { %p483_p12 = por %p482_p11, %p481_p10 }
  0xfd   : > { %p479_p9 = pneg %p478_p7 }
  0xfe   : > { %p485_p0 = por %p484_p13, %p483_p12 }
 0x100   : > { %p486_p1 = pnand %p485_p0, %p479_p9 }
 0x102   : > { %489 = shalt.err (!%p486_p1)
}
 0x103   : > { %403 = dma.vmem_to_hbm [thread:$0]  (%p605_p4), %s638_s18, 256, %s636_s23, %s293_s26  }
 0x104 PF: > { %p409_p2 = scmp.ge.s32.totalorder %s540_s17, 2  ;;  %s321_s9 = sand.u32 1, %s520_s12  }
 0x105   : > { %s322_s10 = scalar_lea.sflag [#allocation3], %s321_s9 }
 0x106   : > { %p406_p3 = pnand %p409_p2, %p612_p8 }
 0x108   : > { %515 = dma.done.wait (!%p406_p3), %s322_s10, 256  }
 0x109   : > { %517 = vsyncadd (!%p406_p3), %s322_s10, 4294967040  ;;  %s16_s17 = sadd.s32 1, %s540_s17   ;;  %s689_s12 = smov %s524_s13 }
 0x10a   : > { %p13_p5 = scmp.ge.s32.totalorder %s16_s17, 4   ;;  %s690_s13 = smov %s528_s14 }
 0x10b   : > { %s691_s14 = smov %s618_s25  ;;  %s692_s15 = smov %s536_s16 }
 0x10c   : > { %s693_s16 = smov %s695_s20  ;;  %15 = sbr.rel (!%p13_p5) target bundleno = 4 (0x4), region = 67 }
 0x113   :  { %327 = vsyncpa [#allocation3], 1 }
 0x114   :  { %329 = vsyncpa [#allocation3 + $0x1], 1 }

</bundles_post_ra>
